<compile_context>
chip_gen: v6e
topology: v6e:2x2x1
jax: 0.10.0
libtpu: 0.0.40
codegen_flags: <defaults>
</compile_context>

<pallas_src>
import jax
import jax.numpy as jnp
from jax import lax
from jax.experimental import pallas as pl
from jax.experimental.pallas import tpu as pltpu

DIM_IN = 64        # base_model output channels (Conv2d dim_in; small demo size)
DIM_OUT = 128      # embedding dim (Conv2d dim_out, default 128)
K_CLUSTERS = 8     # NetVLAD clusters
G_GHOST = 2        # ghost clusters (assignment only, never aggregated)
KP_PAD = 16        # padded soft-assignment width (>= K_CLUSTERS + G_GHOST)
_NEG = -1e30       # bias for padding columns -> exp() underflows to exactly 0

_LANE = 128
_SUBLANE = 8


def _round_up(v, m):
    return ((v + m - 1) // m) * m


def _round_down(v, m):
    return (v // m) * m


# ---------------------------------------------------------------------------
# Tiling heuristics: VMEM-budget-derived row tile + Cin reduction tile
# ---------------------------------------------------------------------------
def _pick_tiling(N, Cin, HW, x_itemsize, out_row_bytes, Cout, channels_last):
    # Per-core VMEM capacity; conservative v7x default if the query is unavailable.
    try:
        vmem_cap = int(pltpu.get_tpu_info().vmem_capacity_bytes)
    except Exception:
        vmem_cap = 64 * 1024 * 1024
    if vmem_cap <= 64 * 1024 * 1024:         # v7x-class core: leave headroom
        vmem_limit = 48 * 1024 * 1024
    else:                                    # v5e / v6e: 128 MiB physical
        vmem_limit = 96 * 1024 * 1024
    budget = vmem_limit - 4 * 1024 * 1024    # weights + compiler scratch slack

    def x_row_bytes(ct):
        if channels_last:                    # block (TB, HW, ct): lanes = ct
            return _round_up(HW, _SUBLANE) * _round_up(ct, _LANE) * x_itemsize
        return _round_up(ct, _SUBLANE) * _round_up(HW, _LANE) * x_itemsize

    # Cin-tile candidates must divide Cin exactly (no partial reduction chunk ever
    # touches out-of-range channels) and respect the (8,128) block rule.
    if channels_last:
        cands = [c for c in (Cin, 2048, 1024, 512, 256, 128)
                 if 0 < c <= Cin and Cin % c == 0 and (c == Cin or c % _LANE == 0)]
    else:
        cands = [c for c in (Cin, 1024, 512, 256, 128, 64, 32, 16, 8)
                 if 0 < c <= Cin and Cin % c == 0]
    cands = sorted(set(cands), reverse=True)

    # Row-tile target: >=2 steps on the "parallel" axis so both v7x TensorCores get
    # work (no effect on 1-TC v5e/v6e), big enough to amortize ~0.35us/step overhead.
    if N <= _SUBLANE:
        tb_target = N                        # block == full batch dim (always legal)
    else:
        tb_target = min(512, _round_up(-(-N // 2), _SUBLANE))

    tb, c_tile = tb_target, cands[-1]
    for ct in cands:
        # 2 x-buffers + 2 output-buffers (vlad + emb2) + 1 accumulator, per row.
        per_row = 2 * x_row_bytes(ct) + 2 * out_row_bytes + Cout * 4
        fit = _round_down(budget // per_row, _SUBLANE)
        if fit >= tb_target:
            tb, c_tile = tb_target, ct       # biggest Cin tile that keeps TB large
            break
        if ct == cands[-1]:
            tb, c_tile = max(_SUBLANE, min(tb_target, fit)), ct
    return tb, c_tile, vmem_limit


# ---------------------------------------------------------------------------
# Fused kernel: spatial sum + 1x1 conv (Cin-tiled accumulation) + GhostVLAD head
# ---------------------------------------------------------------------------
def _make_embednet_kernel(reduce_axis, K, D):
    def kernel(x_ref, w_ref, b_ref, wa_ref, ba_ref, c_ref, vlad_ref, emb2_ref, acc_ref):
        # x_ref:    (TB, C_TILE, HW) bf16 (or (TB, HW, C_TILE) if channels_last)
        # w_ref:    (C_TILE, Cout)   f32 conv weight slice, pre-scaled by 1/HW
        # b_ref:    (1, Cout)        conv bias
        # wa_ref:   (Cout, KP)       soft-assignment weights, padded to KP columns
        # ba_ref:   (1, KP)          soft-assignment bias, padding columns = -1e30
        # c_ref:    (K, Cout)        cluster centroids
        # vlad_ref: (TB, K*Cout)     flattened, fully normalized VLAD descriptor
        # emb2_ref: (TB, Cout)       L2-normalized embedding ("forward2")
        # acc_ref:  (TB, Cout) f32   conv/pool accumulator across Cin tiles
        eps = 1e-12
        ci = pl.program_id(1)

        @pl.when(ci == 0)
        def _init():
            acc_ref[...] = jnp.zeros_like(acc_ref)

        # Spatial sum in f32 (bf16 stream -> f32 accumulation), then partial conv.
        pooled = jnp.sum(x_ref[...].astype(jnp.float32), axis=reduce_axis)   # (TB, C_TILE)
        acc_ref[...] += jnp.dot(pooled, w_ref[...],
                                preferred_element_type=jnp.float32)          # (TB, Cout)

        @pl.when(ci == pl.num_programs(1) - 1)
        def _finalize():
            e = acc_ref[...] + b_ref[...]                                    # conv bias

            # F.normalize(x, dim=1): rsqrt on the EUP instead of sqrt+divide
            ss = jnp.sum(e * e, axis=1, keepdims=True)                       # (TB, 1)
            xn = e * lax.rsqrt(jnp.maximum(ss, eps * eps))                   # (TB, Cout)
            emb2_ref[...] = xn.astype(emb2_ref.dtype)

            # Soft assignment over K+G (padded to KP) clusters; ghosts/padding drop out.
            logits = jnp.dot(xn, wa_ref[...],
                             preferred_element_type=jnp.float32) + ba_ref[...]
            m = jnp.max(logits, axis=1, keepdims=True)
            p = jnp.exp(logits - m)                                          # pad cols -> 0
            a = p * pl.reciprocal(jnp.sum(p, axis=1, keepdims=True), approx=True)

            c = c_ref[...]                                                   # (K, D)
            # Pass 1: per-cluster inverse norms + global sum-of-squares (no stores).
            gsq = jnp.zeros_like(ss)
            invs = []
            for k in range(K):                                               # K=8, static
                resid = a[:, k:k + 1] * (xn - c[k])                          # (TB, D)
                ssq = jnp.sum(resid * resid, axis=1, keepdims=True)
                inv_k = lax.rsqrt(jnp.maximum(ssq, eps * eps))
                invs.append(inv_k)
                gsq = gsq + ssq * (inv_k * inv_k)                            # ||intra_k||^2
            ginv = lax.rsqrt(jnp.maximum(gsq, eps * eps))
            # Pass 2: recompute residual (2 VALU ops/elem) and store each lane-dense
            # 128-wide slice exactly once -- no (TB, K*D) read-modify-write pass.
            for k in range(K):
                resid = a[:, k:k + 1] * (xn - c[k])
                vlad_ref[:, k * D:(k + 1) * D] = (resid * (invs[k] * ginv)).astype(vlad_ref.dtype)

    return kernel


def embed_net_fused(x_flat, w_io, b_1o, wa_pad, ba_pad, cent, *, channels_last=False):
    """x_flat: (N, Cin, H*W) [default] or (N, H*W, Cin) [channels_last=True]."""
    if channels_last:
        N, HW, Cin = x_flat.shape
    else:
        N, Cin, HW = x_flat.shape
    Cout = w_io.shape[1]
    K, D = cent.shape
    assert D == Cout

    out_row_bytes = (K * D + Cout) * 4       # f32 vlad + emb2 rows
    TB, C_TILE, vmem_limit = _pick_tiling(N, Cin, HW, x_flat.dtype.itemsize,
                                          out_row_bytes, Cout, channels_last)
    n_row_steps = pl.cdiv(N, TB)
    n_c_steps = Cin // C_TILE                # C_TILE divides Cin by construction

    if channels_last:
        x_spec = pl.BlockSpec((TB, HW, C_TILE), lambda n, c: (n, 0, c))
        reduce_axis = 1
    else:
        x_spec = pl.BlockSpec((TB, C_TILE, HW), lambda n, c: (n, c, 0))
        reduce_axis = 2
    # TODO(synk): if a profile shows exposed DMA at small TB on v7x, sweep
    # pipeline_mode=pl.Buffered(3) on x_spec against the default double-buffering.

    kernel = _make_embednet_kernel(reduce_axis, K, D)
    return pl.pallas_call(
        kernel,
        out_shape=(
            jax.ShapeDtypeStruct((N, K * Cout), jnp.float32),
            jax.ShapeDtypeStruct((N, Cout), jnp.float32),
        ),
        grid=(n_row_steps, n_c_steps),       # reduction (Cin) axis last
        in_specs=[
            x_spec,
            pl.BlockSpec((C_TILE, Cout), lambda n, c: (c, 0)),
            pl.BlockSpec((1, Cout), lambda n, c: (0, 0)),
            pl.BlockSpec((Cout, KP_PAD), lambda n, c: (0, 0)),
            pl.BlockSpec((1, KP_PAD), lambda n, c: (0, 0)),
            pl.BlockSpec((K, Cout), lambda n, c: (0, 0)),
        ],
        out_specs=(
            pl.BlockSpec((TB, K * Cout), lambda n, c: (n, 0)),
            pl.BlockSpec((TB, Cout), lambda n, c: (n, 0)),
        ),
        scratch_shapes=[pltpu.VMEM((TB, Cout), jnp.float32)],
        compiler_params=pltpu.CompilerParams(
            dimension_semantics=("parallel", "arbitrary"),
            vmem_limit_bytes=vmem_limit,
        ),
    )(x_flat, w_io, b_1o, wa_pad, ba_pad, cent)


# ---------------------------------------------------------------------------
# Parameters + wrapper
# ---------------------------------------------------------------------------
def init_params(key):
    k1, k2, k3, k4, k5 = jax.random.split(key, 5)
    conv_w = jax.random.normal(k1, (DIM_OUT, DIM_IN), jnp.float32) / jnp.sqrt(DIM_IN)
    conv_b = jax.random.normal(k2, (1, DIM_OUT), jnp.float32) * 0.01
    wa = jax.random.normal(k3, (DIM_OUT, K_CLUSTERS + G_GHOST), jnp.float32) / jnp.sqrt(DIM_OUT)
    ba = jax.random.normal(k4, (1, K_CLUSTERS + G_GHOST), jnp.float32) * 0.01
    cent = jax.random.normal(k5, (K_CLUSTERS, DIM_OUT), jnp.float32)
    return dict(conv_w=conv_w, conv_b=conv_b, wa=wa, ba=ba, centroids=cent)


def _pad_assignment(wa, ba, kp=KP_PAD):
    d, kg = wa.shape
    wa_p = jnp.zeros((d, kp), wa.dtype).at[:, :kg].set(wa)
    ba_p = jnp.full((1, kp), _NEG, ba.dtype).at[:, :kg].set(ba)
    return wa_p, ba_p


def embed_net_forward(feats_nchw, params, *, stream_dtype=jnp.bfloat16):
    # TODO(synk): base_model is a constructor-injected backbone with no definition in
    # the provided module; the kernel consumes its output feature map directly (NCHW).
    # If the backbone can emit NHWC and Cin % 128 == 0, flatten to (N, H*W, Cin) and
    # call embed_net_fused(..., channels_last=True) to avoid HW lane padding.
    N, Cin, H, W = feats_nchw.shape
    HW = H * W
    # Trailing-dim flatten (no transpose/copy); bf16 stream halves HBM bytes, the
    # kernel accumulates the spatial sum and matmuls in f32.
    x = feats_nchw.reshape(N, Cin, HW).astype(stream_dtype)
    # (Cin, Cout) conv weight with the 1/HW pooling scale folded in (tiny, host-side).
    w_io = jnp.transpose(params["conv_w"]).astype(jnp.float32) * (1.0 / HW)

    wa_pad, ba_pad = _pad_assignment(params["wa"], params["ba"])
    # NOTE: PyTorch x.squeeze() would also drop the batch dim at N == 1; we keep (N, D)
    # so shapes stay rank-stable (matches the original only for N > 1).
    vlad_flat, emb2 = embed_net_fused(
        x, w_io, params["conv_b"], wa_pad, ba_pad, params["centroids"])
    # TODO(synk): net_vlad is also constructor-injected (gostVALD); implemented as a
    # GhostVLAD-style layer (soft assign over K+G clusters, aggregate K residuals,
    # intra + global L2 norm); forward2 is taken to be the L2-normalized embedding.
    return vlad_flat, emb2


if __name__ == "__main__":
    key = jax.random.PRNGKey(0)
    pkey, xkey = jax.random.split(key)
    params = init_params(pkey)

    N, H, W = 2, 8, 8
    feats = jax.random.normal(xkey, (N, DIM_IN, H, W), jnp.float32)      # NCHW base_model output

    embedded_x, emb2 = embed_net_forward(feats, params)
    jax.block_until_ready((embedded_x, emb2))

    assert embedded_x.shape == (N, K_CLUSTERS * DIM_OUT)
    assert emb2.shape == (N, DIM_OUT)
    assert bool(jnp.all(jnp.isfinite(embedded_x))) and bool(jnp.all(jnp.isfinite(emb2)))
    print("KERNEL_OK")
</pallas_src>

<mosaic_0001>
module attributes {stable_mosaic.version = 11 : i64} {
  func.func @kernel(%arg0: i32, %arg1: i32, %arg2: memref<2x64x64xbf16, #tpu.memory_space<vmem>>, %arg3: memref<64x128xf32, #tpu.memory_space<vmem>>, %arg4: memref<1x128xf32, #tpu.memory_space<vmem>>, %arg5: memref<128x16xf32, #tpu.memory_space<vmem>>, %arg6: memref<1x16xf32, #tpu.memory_space<vmem>>, %arg7: memref<8x128xf32, #tpu.memory_space<vmem>>, %arg8: memref<2x1024xf32, #tpu.memory_space<vmem>>, %arg9: memref<2x128xf32, #tpu.memory_space<vmem>>, %arg10: memref<2x128xf32, #tpu.memory_space<vmem>>) attributes {dimension_semantics = [#tpu.dimension_semantics<parallel>, #tpu.dimension_semantics<arbitrary>], iteration_bounds = array<i64: 1, 1>, scalar_prefetch = 0 : i64, scratch_operands = 1 : i64, tpu.core_type = #tpu.core_type<tc>, window_params = [{transform_indices = @transform_0, window_bounds = array<i64: 2, 64, 64>}, {transform_indices = @transform_1, window_bounds = array<i64: 64, 128>}, {pipeline_mode = #tpu.pipeline_mode<synchronous>, transform_indices = @transform_2, window_bounds = array<i64: 1, 128>}, {pipeline_mode = #tpu.pipeline_mode<synchronous>, transform_indices = @transform_3, window_bounds = array<i64: 128, 16>}, {pipeline_mode = #tpu.pipeline_mode<synchronous>, transform_indices = @transform_4, window_bounds = array<i64: 1, 16>}, {pipeline_mode = #tpu.pipeline_mode<synchronous>, transform_indices = @transform_5, window_bounds = array<i64: 8, 128>}, {transform_indices = @transform_6, window_bounds = array<i64: 2, 1024>}, {transform_indices = @transform_7, window_bounds = array<i64: 2, 128>}]} {
    %c0_i32 = arith.constant 0 : i32
    %0 = arith.cmpi eq, %arg1, %c0_i32 : i32
    %1 = arith.extui %0 : i1 to i32
    %c0_i32_0 = arith.constant 0 : i32
    %2 = arith.cmpi ne, %1, %c0_i32_0 : i32
    scf.if %2 {
      %cst_12 = arith.constant 0.000000e+00 : f32
      %14 = vector.broadcast %cst_12 : f32 to vector<2x128xf32>
      %c0_13 = arith.constant 0 : index
      %c0_14 = arith.constant 0 : index
      %15 = vector.load %arg10[%c0_13, %c0_14] : memref<2x128xf32, #tpu.memory_space<vmem>>, vector<2x128xf32>
      tpu.vector_store %arg10[%c0_13, %c0_14], %14 {strides = array<i32>} : memref<2x128xf32, #tpu.memory_space<vmem>>, vector<2x128xf32>,
    } else {
    }
    %c0 = arith.constant 0 : index
    %c0_1 = arith.constant 0 : index
    %c0_2 = arith.constant 0 : index
    %3 = vector.load %arg2[%c0, %c0_1, %c0_2] : memref<2x64x64xbf16, #tpu.memory_space<vmem>>, vector<2x64x64xbf16>
    %4 = arith.extf %3 : vector<2x64x64xbf16> to vector<2x64x64xf32>
    %cst = arith.constant dense<0.000000e+00> : vector<2x64xf32>
    %5 = vector.multi_reduction <add>, %4, %cst [2] : vector<2x64x64xf32> to vector<2x64xf32>
    %c0_3 = arith.constant 0 : index
    %c0_4 = arith.constant 0 : index
    %6 = vector.load %arg10[%c0_3, %c0_4] : memref<2x128xf32, #tpu.memory_space<vmem>>, vector<2x128xf32>
    %c0_5 = arith.constant 0 : index
    %c0_6 = arith.constant 0 : index
    %7 = vector.load %arg3[%c0_5, %c0_6] : memref<64x128xf32, #tpu.memory_space<vmem>>, vector<64x128xf32>
    %cst_7 = arith.constant dense<0.000000e+00> : vector<2x128xf32>
    %8 = tpu.matmul %5, %7, %cst_7 {dimension_numbers = #tpu.dot_dimension_numbers<[1], [0], [0], [1], [0, 0, 1, 1], [], []>} : vector<2x64xf32>, vector<64x128xf32>, vector<2x128xf32> -> vector<2x128xf32>
    %9 = arith.addf %6, %8 : vector<2x128xf32>
    %c0_8 = arith.constant 0 : index
    %c0_9 = arith.constant 0 : index
    %10 = vector.load %arg10[%c0_8, %c0_9] : memref<2x128xf32, #tpu.memory_space<vmem>>, vector<2x128xf32>
    tpu.vector_store %arg10[%c0_8, %c0_9], %9 {strides = array<i32>} : memref<2x128xf32, #tpu.memory_space<vmem>>, vector<2x128xf32>,
    %c0_i32_10 = arith.constant 0 : i32
    %11 = arith.cmpi eq, %arg1, %c0_i32_10 : i32
    %12 = arith.extui %11 : i1 to i32
    %c0_i32_11 = arith.constant 0 : i32
    %13 = arith.cmpi ne, %12, %c0_i32_11 : i32
    scf.if %13 {
      %c0_12 = arith.constant 0 : index
      %c0_13 = arith.constant 0 : index
      %14 = vector.load %arg10[%c0_12, %c0_13] : memref<2x128xf32, #tpu.memory_space<vmem>>, vector<2x128xf32>
      %c0_14 = arith.constant 0 : index
      %c0_15 = arith.constant 0 : index
      %15 = vector.load %arg4[%c0_14, %c0_15] : memref<1x128xf32, #tpu.memory_space<vmem>>, vector<1x128xf32>
      %16 = vector.broadcast %15 : vector<1x128xf32> to vector<2x128xf32>
      %17 = arith.addf %14, %16 : vector<2x128xf32>
      %18 = arith.mulf %17, %17 : vector<2x128xf32>
      %cst_16 = arith.constant dense<0.000000e+00> : vector<2xf32>
      %19 = vector.multi_reduction <add>, %18, %cst_16 [1] : vector<2x128xf32> to vector<2xf32>
      %20 = vector.shape_cast %19 : vector<2xf32> to vector<2x1xf32>
      %cst_17 = arith.constant 1.000000e-24 : f32
      %21 = vector.broadcast %cst_17 : f32 to vector<2x1xf32>
      %22 = arith.maximumf %20, %21 : vector<2x1xf32>
      %23 = math.rsqrt %22 : vector<2x1xf32>
      %24 = vector.broadcast %23 : vector<2x1xf32> to vector<2x128xf32>
      %25 = arith.mulf %17, %24 : vector<2x128xf32>
      %c0_18 = arith.constant 0 : index
      %c0_19 = arith.constant 0 : index
      %26 = vector.load %arg9[%c0_18, %c0_19] : memref<2x128xf32, #tpu.memory_space<vmem>>, vector<2x128xf32>
      tpu.vector_store %arg9[%c0_18, %c0_19], %25 {strides = array<i32>} : memref<2x128xf32, #tpu.memory_space<vmem>>, vector<2x128xf32>,
      %c0_20 = arith.constant 0 : index
      %c0_21 = arith.constant 0 : index
      %27 = vector.load %arg5[%c0_20, %c0_21] : memref<128x16xf32, #tpu.memory_space<vmem>>, vector<128x16xf32>
      %cst_22 = arith.constant dense<0.000000e+00> : vector<2x16xf32>
      %28 = tpu.matmul %25, %27, %cst_22 {dimension_numbers = #tpu.dot_dimension_numbers<[1], [0], [0], [1], [0, 0, 1, 1], [], []>} : vector<2x128xf32>, vector<128x16xf32>, vector<2x16xf32> -> vector<2x16xf32>
      %c0_23 = arith.constant 0 : index
      %c0_24 = arith.constant 0 : index
      %29 = vector.load %arg6[%c0_23, %c0_24] : memref<1x16xf32, #tpu.memory_space<vmem>>, vector<1x16xf32>
      %30 = vector.broadcast %29 : vector<1x16xf32> to vector<2x16xf32>
      %31 = arith.addf %28, %30 : vector<2x16xf32>
      %cst_25 = arith.constant dense<0xFF800000> : vector<2xf32>
      %32 = vector.multi_reduction <maximumf>, %31, %cst_25 [1] : vector<2x16xf32> to vector<2xf32>
      %33 = vector.shape_cast %32 : vector<2xf32> to vector<2x1xf32>
      %34 = vector.broadcast %33 : vector<2x1xf32> to vector<2x16xf32>
      %35 = arith.subf %31, %34 : vector<2x16xf32>
      %36 = math.exp %35 : vector<2x16xf32>
      %cst_26 = arith.constant dense<0.000000e+00> : vector<2xf32>
      %37 = vector.multi_reduction <add>, %36, %cst_26 [1] : vector<2x16xf32> to vector<2xf32>
      %38 = vector.shape_cast %37 : vector<2xf32> to vector<2x1xf32>
      %39 = tpu.reciprocal %38 {approx = true} : vector<2x1xf32> -> vector<2x1xf32>
      %40 = vector.broadcast %39 : vector<2x1xf32> to vector<2x16xf32>
      %41 = arith.mulf %36, %40 : vector<2x16xf32>
      %c0_27 = arith.constant 0 : index
      %c0_28 = arith.constant 0 : index
      %42 = vector.load %arg7[%c0_27, %c0_28] : memref<8x128xf32, #tpu.memory_space<vmem>>, vector<8x128xf32>
      %cst_29 = arith.constant 0.000000e+00 : f32
      %43 = vector.broadcast %cst_29 : f32 to vector<2x1xf32>
      %44 = vector.extract_strided_slice %41 {offsets = [0, 0], sizes = [2, 1], strides = [1, 1]} : vector<2x16xf32> to vector<2x1xf32>
      %45 = vector.extract_strided_slice %42 {offsets = [0, 0], sizes = [1, 128], strides = [1, 1]} : vector<8x128xf32> to vector<1x128xf32>
      %46 = vector.shape_cast %45 : vector<1x128xf32> to vector<128xf32>
      %47 = vector.shape_cast %46 : vector<128xf32> to vector<1x128xf32>
      %48 = vector.broadcast %47 : vector<1x128xf32> to vector<2x128xf32>
      %49 = arith.subf %25, %48 : vector<2x128xf32>
      %50 = vector.broadcast %44 : vector<2x1xf32> to vector<2x128xf32>
      %51 = arith.mulf %50, %49 : vector<2x128xf32>
      %52 = arith.mulf %51, %51 : vector<2x128xf32>
      %cst_30 = arith.constant dense<0.000000e+00> : vector<2xf32>
      %53 = vector.multi_reduction <add>, %52, %cst_30 [1] : vector<2x128xf32> to vector<2xf32>
      %54 = vector.shape_cast %53 : vector<2xf32> to vector<2x1xf32>
      %cst_31 = arith.constant 1.000000e-24 : f32
      %55 = vector.broadcast %cst_31 : f32 to vector<2x1xf32>
      %56 = arith.maximumf %54, %55 : vector<2x1xf32>
      %57 = math.rsqrt %56 : vector<2x1xf32>
      %58 = arith.mulf %57, %57 : vector<2x1xf32>
      %59 = arith.mulf %54, %58 : vector<2x1xf32>
      %60 = arith.addf %43, %59 : vector<2x1xf32>
      %61 = vector.extract_strided_slice %41 {offsets = [0, 1], sizes = [2, 1], strides = [1, 1]} : vector<2x16xf32> to vector<2x1xf32>
      %62 = vector.extract_strided_slice %42 {offsets = [1, 0], sizes = [1, 128], strides = [1, 1]} : vector<8x128xf32> to vector<1x128xf32>
      %63 = vector.shape_cast %62 : vector<1x128xf32> to vector<128xf32>
      %64 = vector.shape_cast %63 : vector<128xf32> to vector<1x128xf32>
      %65 = vector.broadcast %64 : vector<1x128xf32> to vector<2x128xf32>
      %66 = arith.subf %25, %65 : vector<2x128xf32>
      %67 = vector.broadcast %61 : vector<2x1xf32> to vector<2x128xf32>
      %68 = arith.mulf %67, %66 : vector<2x128xf32>
      %69 = arith.mulf %68, %68 : vector<2x128xf32>
      %cst_32 = arith.constant dense<0.000000e+00> : vector<2xf32>
      %70 = vector.multi_reduction <add>, %69, %cst_32 [1] : vector<2x128xf32> to vector<2xf32>
      %71 = vector.shape_cast %70 : vector<2xf32> to vector<2x1xf32>
      %cst_33 = arith.constant 1.000000e-24 : f32
      %72 = vector.broadcast %cst_33 : f32 to vector<2x1xf32>
      %73 = arith.maximumf %71, %72 : vector<2x1xf32>
      %74 = math.rsqrt %73 : vector<2x1xf32>
      %75 = arith.mulf %74, %74 : vector<2x1xf32>
      %76 = arith.mulf %71, %75 : vector<2x1xf32>
      %77 = arith.addf %60, %76 : vector<2x1xf32>
      %78 = vector.extract_strided_slice %41 {offsets = [0, 2], sizes = [2, 1], strides = [1, 1]} : vector<2x16xf32> to vector<2x1xf32>
      %79 = vector.extract_strided_slice %42 {offsets = [2, 0], sizes = [1, 128], strides = [1, 1]} : vector<8x128xf32> to vector<1x128xf32>
      %80 = vector.shape_cast %79 : vector<1x128xf32> to vector<128xf32>
      %81 = vector.shape_cast %80 : vector<128xf32> to vector<1x128xf32>
      %82 = vector.broadcast %81 : vector<1x128xf32> to vector<2x128xf32>
      %83 = arith.subf %25, %82 : vector<2x128xf32>
      %84 = vector.broadcast %78 : vector<2x1xf32> to vector<2x128xf32>
      %85 = arith.mulf %84, %83 : vector<2x128xf32>
      %86 = arith.mulf %85, %85 : vector<2x128xf32>
      %cst_34 = arith.constant dense<0.000000e+00> : vector<2xf32>
      %87 = vector.multi_reduction <add>, %86, %cst_34 [1] : vector<2x128xf32> to vector<2xf32>
      %88 = vector.shape_cast %87 : vector<2xf32> to vector<2x1xf32>
      %cst_35 = arith.constant 1.000000e-24 : f32
      %89 = vector.broadcast %cst_35 : f32 to vector<2x1xf32>
      %90 = arith.maximumf %88, %89 : vector<2x1xf32>
      %91 = math.rsqrt %90 : vector<2x1xf32>
      %92 = arith.mulf %91, %91 : vector<2x1xf32>
      %93 = arith.mulf %88, %92 : vector<2x1xf32>
      %94 = arith.addf %77, %93 : vector<2x1xf32>
      %95 = vector.extract_strided_slice %41 {offsets = [0, 3], sizes = [2, 1], strides = [1, 1]} : vector<2x16xf32> to vector<2x1xf32>
      %96 = vector.extract_strided_slice %42 {offsets = [3, 0], sizes = [1, 128], strides = [1, 1]} : vector<8x128xf32> to vector<1x128xf32>
      %97 = vector.shape_cast %96 : vector<1x128xf32> to vector<128xf32>
      %98 = vector.shape_cast %97 : vector<128xf32> to vector<1x128xf32>
      %99 = vector.broadcast %98 : vector<1x128xf32> to vector<2x128xf32>
      %100 = arith.subf %25, %99 : vector<2x128xf32>
      %101 = vector.broadcast %95 : vector<2x1xf32> to vector<2x128xf32>
      %102 = arith.mulf %101, %100 : vector<2x128xf32>
      %103 = arith.mulf %102, %102 : vector<2x128xf32>
      %cst_36 = arith.constant dense<0.000000e+00> : vector<2xf32>
      %104 = vector.multi_reduction <add>, %103, %cst_36 [1] : vector<2x128xf32> to vector<2xf32>
      %105 = vector.shape_cast %104 : vector<2xf32> to vector<2x1xf32>
      %cst_37 = arith.constant 1.000000e-24 : f32
      %106 = vector.broadcast %cst_37 : f32 to vector<2x1xf32>
      %107 = arith.maximumf %105, %106 : vector<2x1xf32>
      %108 = math.rsqrt %107 : vector<2x1xf32>
      %109 = arith.mulf %108, %108 : vector<2x1xf32>
      %110 = arith.mulf %105, %109 : vector<2x1xf32>
      %111 = arith.addf %94, %110 : vector<2x1xf32>
      %112 = vector.extract_strided_slice %41 {offsets = [0, 4], sizes = [2, 1], strides = [1, 1]} : vector<2x16xf32> to vector<2x1xf32>
      %113 = vector.extract_strided_slice %42 {offsets = [4, 0], sizes = [1, 128], strides = [1, 1]} : vector<8x128xf32> to vector<1x128xf32>
      %114 = vector.shape_cast %113 : vector<1x128xf32> to vector<128xf32>
      %115 = vector.shape_cast %114 : vector<128xf32> to vector<1x128xf32>
      %116 = vector.broadcast %115 : vector<1x128xf32> to vector<2x128xf32>
      %117 = arith.subf %25, %116 : vector<2x128xf32>
      %118 = vector.broadcast %112 : vector<2x1xf32> to vector<2x128xf32>
      %119 = arith.mulf %118, %117 : vector<2x128xf32>
      %120 = arith.mulf %119, %119 : vector<2x128xf32>
      %cst_38 = arith.constant dense<0.000000e+00> : vector<2xf32>
      %121 = vector.multi_reduction <add>, %120, %cst_38 [1] : vector<2x128xf32> to vector<2xf32>
      %122 = vector.shape_cast %121 : vector<2xf32> to vector<2x1xf32>
      %cst_39 = arith.constant 1.000000e-24 : f32
      %123 = vector.broadcast %cst_39 : f32 to vector<2x1xf32>
      %124 = arith.maximumf %122, %123 : vector<2x1xf32>
      %125 = math.rsqrt %124 : vector<2x1xf32>
      %126 = arith.mulf %125, %125 : vector<2x1xf32>
      %127 = arith.mulf %122, %126 : vector<2x1xf32>
      %128 = arith.addf %111, %127 : vector<2x1xf32>
      %129 = vector.extract_strided_slice %41 {offsets = [0, 5], sizes = [2, 1], strides = [1, 1]} : vector<2x16xf32> to vector<2x1xf32>
      %130 = vector.extract_strided_slice %42 {offsets = [5, 0], sizes = [1, 128], strides = [1, 1]} : vector<8x128xf32> to vector<1x128xf32>
      %131 = vector.shape_cast %130 : vector<1x128xf32> to vector<128xf32>
      %132 = vector.shape_cast %131 : vector<128xf32> to vector<1x128xf32>
      %133 = vector.broadcast %132 : vector<1x128xf32> to vector<2x128xf32>
      %134 = arith.subf %25, %133 : vector<2x128xf32>
      %135 = vector.broadcast %129 : vector<2x1xf32> to vector<2x128xf32>
      %136 = arith.mulf %135, %134 : vector<2x128xf32>
      %137 = arith.mulf %136, %136 : vector<2x128xf32>
      %cst_40 = arith.constant dense<0.000000e+00> : vector<2xf32>
      %138 = vector.multi_reduction <add>, %137, %cst_40 [1] : vector<2x128xf32> to vector<2xf32>
      %139 = vector.shape_cast %138 : vector<2xf32> to vector<2x1xf32>
      %cst_41 = arith.constant 1.000000e-24 : f32
      %140 = vector.broadcast %cst_41 : f32 to vector<2x1xf32>
      %141 = arith.maximumf %139, %140 : vector<2x1xf32>
      %142 = math.rsqrt %141 : vector<2x1xf32>
      %143 = arith.mulf %142, %142 : vector<2x1xf32>
      %144 = arith.mulf %139, %143 : vector<2x1xf32>
      %145 = arith.addf %128, %144 : vector<2x1xf32>
      %146 = vector.extract_strided_slice %41 {offsets = [0, 6], sizes = [2, 1], strides = [1, 1]} : vector<2x16xf32> to vector<2x1xf32>
      %147 = vector.extract_strided_slice %42 {offsets = [6, 0], sizes = [1, 128], strides = [1, 1]} : vector<8x128xf32> to vector<1x128xf32>
      %148 = vector.shape_cast %147 : vector<1x128xf32> to vector<128xf32>
      %149 = vector.shape_cast %148 : vector<128xf32> to vector<1x128xf32>
      %150 = vector.broadcast %149 : vector<1x128xf32> to vector<2x128xf32>
      %151 = arith.subf %25, %150 : vector<2x128xf32>
      %152 = vector.broadcast %146 : vector<2x1xf32> to vector<2x128xf32>
      %153 = arith.mulf %152, %151 : vector<2x128xf32>
      %154 = arith.mulf %153, %153 : vector<2x128xf32>
      %cst_42 = arith.constant dense<0.000000e+00> : vector<2xf32>
      %155 = vector.multi_reduction <add>, %154, %cst_42 [1] : vector<2x128xf32> to vector<2xf32>
      %156 = vector.shape_cast %155 : vector<2xf32> to vector<2x1xf32>
      %cst_43 = arith.constant 1.000000e-24 : f32
      %157 = vector.broadcast %cst_43 : f32 to vector<2x1xf32>
      %158 = arith.maximumf %156, %157 : vector<2x1xf32>
      %159 = math.rsqrt %158 : vector<2x1xf32>
      %160 = arith.mulf %159, %159 : vector<2x1xf32>
      %161 = arith.mulf %156, %160 : vector<2x1xf32>
      %162 = arith.addf %145, %161 : vector<2x1xf32>
      %163 = vector.extract_strided_slice %41 {offsets = [0, 7], sizes = [2, 1], strides = [1, 1]} : vector<2x16xf32> to vector<2x1xf32>
      %164 = vector.extract_strided_slice %42 {offsets = [7, 0], sizes = [1, 128], strides = [1, 1]} : vector<8x128xf32> to vector<1x128xf32>
      %165 = vector.shape_cast %164 : vector<1x128xf32> to vector<128xf32>
      %166 = vector.shape_cast %165 : vector<128xf32> to vector<1x128xf32>
      %167 = vector.broadcast %166 : vector<1x128xf32> to vector<2x128xf32>
      %168 = arith.subf %25, %167 : vector<2x128xf32>
      %169 = vector.broadcast %163 : vector<2x1xf32> to vector<2x128xf32>
      %170 = arith.mulf %169, %168 : vector<2x128xf32>
      %171 = arith.mulf %170, %170 : vector<2x128xf32>
      %cst_44 = arith.constant dense<0.000000e+00> : vector<2xf32>
      %172 = vector.multi_reduction <add>, %171, %cst_44 [1] : vector<2x128xf32> to vector<2xf32>
      %173 = vector.shape_cast %172 : vector<2xf32> to vector<2x1xf32>
      %cst_45 = arith.constant 1.000000e-24 : f32
      %174 = vector.broadcast %cst_45 : f32 to vector<2x1xf32>
      %175 = arith.maximumf %173, %174 : vector<2x1xf32>
      %176 = math.rsqrt %175 : vector<2x1xf32>
      %177 = arith.mulf %176, %176 : vector<2x1xf32>
      %178 = arith.mulf %173, %177 : vector<2x1xf32>
      %179 = arith.addf %162, %178 : vector<2x1xf32>
      %cst_46 = arith.constant 1.000000e-24 : f32
      %180 = vector.broadcast %cst_46 : f32 to vector<2x1xf32>
      %181 = arith.maximumf %179, %180 : vector<2x1xf32>
      %182 = math.rsqrt %181 : vector<2x1xf32>
      %183 = vector.extract_strided_slice %41 {offsets = [0, 0], sizes = [2, 1], strides = [1, 1]} : vector<2x16xf32> to vector<2x1xf32>
      %184 = vector.extract_strided_slice %42 {offsets = [0, 0], sizes = [1, 128], strides = [1, 1]} : vector<8x128xf32> to vector<1x128xf32>
      %185 = vector.shape_cast %184 : vector<1x128xf32> to vector<128xf32>
      %186 = vector.shape_cast %185 : vector<128xf32> to vector<1x128xf32>
      %187 = vector.broadcast %186 : vector<1x128xf32> to vector<2x128xf32>
      %188 = arith.subf %25, %187 : vector<2x128xf32>
      %189 = vector.broadcast %183 : vector<2x1xf32> to vector<2x128xf32>
      %190 = arith.mulf %189, %188 : vector<2x128xf32>
      %191 = arith.mulf %57, %182 : vector<2x1xf32>
      %192 = vector.broadcast %191 : vector<2x1xf32> to vector<2x128xf32>
      %193 = arith.mulf %190, %192 : vector<2x128xf32>
      %c0_47 = arith.constant 0 : index
      %c0_48 = arith.constant 0 : index
      %194 = vector.load %arg8[%c0_47, %c0_48] : memref<2x1024xf32, #tpu.memory_space<vmem>>, vector<2x128xf32>
      tpu.vector_store %arg8[%c0_47, %c0_48], %193 {strides = array<i32>} : memref<2x1024xf32, #tpu.memory_space<vmem>>, vector<2x128xf32>,
      %195 = vector.extract_strided_slice %41 {offsets = [0, 1], sizes = [2, 1], strides = [1, 1]} : vector<2x16xf32> to vector<2x1xf32>
      %196 = vector.extract_strided_slice %42 {offsets = [1, 0], sizes = [1, 128], strides = [1, 1]} : vector<8x128xf32> to vector<1x128xf32>
      %197 = vector.shape_cast %196 : vector<1x128xf32> to vector<128xf32>
      %198 = vector.shape_cast %197 : vector<128xf32> to vector<1x128xf32>
      %199 = vector.broadcast %198 : vector<1x128xf32> to vector<2x128xf32>
      %200 = arith.subf %25, %199 : vector<2x128xf32>
      %201 = vector.broadcast %195 : vector<2x1xf32> to vector<2x128xf32>
      %202 = arith.mulf %201, %200 : vector<2x128xf32>
      %203 = arith.mulf %74, %182 : vector<2x1xf32>
      %204 = vector.broadcast %203 : vector<2x1xf32> to vector<2x128xf32>
      %205 = arith.mulf %202, %204 : vector<2x128xf32>
      %c0_49 = arith.constant 0 : index
      %c128 = arith.constant 128 : index
      %206 = vector.load %arg8[%c0_49, %c128] : memref<2x1024xf32, #tpu.memory_space<vmem>>, vector<2x128xf32>
      tpu.vector_store %arg8[%c0_49, %c128], %205 {strides = array<i32>} : memref<2x1024xf32, #tpu.memory_space<vmem>>, vector<2x128xf32>,
      %207 = vector.extract_strided_slice %41 {offsets = [0, 2], sizes = [2, 1], strides = [1, 1]} : vector<2x16xf32> to vector<2x1xf32>
      %208 = vector.extract_strided_slice %42 {offsets = [2, 0], sizes = [1, 128], strides = [1, 1]} : vector<8x128xf32> to vector<1x128xf32>
      %209 = vector.shape_cast %208 : vector<1x128xf32> to vector<128xf32>
      %210 = vector.shape_cast %209 : vector<128xf32> to vector<1x128xf32>
      %211 = vector.broadcast %210 : vector<1x128xf32> to vector<2x128xf32>
      %212 = arith.subf %25, %211 : vector<2x128xf32>
      %213 = vector.broadcast %207 : vector<2x1xf32> to vector<2x128xf32>
      %214 = arith.mulf %213, %212 : vector<2x128xf32>
      %215 = arith.mulf %91, %182 : vector<2x1xf32>
      %216 = vector.broadcast %215 : vector<2x1xf32> to vector<2x128xf32>
      %217 = arith.mulf %214, %216 : vector<2x128xf32>
      %c0_50 = arith.constant 0 : index
      %c256 = arith.constant 256 : index
      %218 = vector.load %arg8[%c0_50, %c256] : memref<2x1024xf32, #tpu.memory_space<vmem>>, vector<2x128xf32>
      tpu.vector_store %arg8[%c0_50, %c256], %217 {strides = array<i32>} : memref<2x1024xf32, #tpu.memory_space<vmem>>, vector<2x128xf32>,
      %219 = vector.extract_strided_slice %41 {offsets = [0, 3], sizes = [2, 1], strides = [1, 1]} : vector<2x16xf32> to vector<2x1xf32>
      %220 = vector.extract_strided_slice %42 {offsets = [3, 0], sizes = [1, 128], strides = [1, 1]} : vector<8x128xf32> to vector<1x128xf32>
      %221 = vector.shape_cast %220 : vector<1x128xf32> to vector<128xf32>
      %222 = vector.shape_cast %221 : vector<128xf32> to vector<1x128xf32>
      %223 = vector.broadcast %222 : vector<1x128xf32> to vector<2x128xf32>
      %224 = arith.subf %25, %223 : vector<2x128xf32>
      %225 = vector.broadcast %219 : vector<2x1xf32> to vector<2x128xf32>
      %226 = arith.mulf %225, %224 : vector<2x128xf32>
      %227 = arith.mulf %108, %182 : vector<2x1xf32>
      %228 = vector.broadcast %227 : vector<2x1xf32> to vector<2x128xf32>
      %229 = arith.mulf %226, %228 : vector<2x128xf32>
      %c0_51 = arith.constant 0 : index
      %c384 = arith.constant 384 : index
      %230 = vector.load %arg8[%c0_51, %c384] : memref<2x1024xf32, #tpu.memory_space<vmem>>, vector<2x128xf32>
      tpu.vector_store %arg8[%c0_51, %c384], %229 {strides = array<i32>} : memref<2x1024xf32, #tpu.memory_space<vmem>>, vector<2x128xf32>,
      %231 = vector.extract_strided_slice %41 {offsets = [0, 4], sizes = [2, 1], strides = [1, 1]} : vector<2x16xf32> to vector<2x1xf32>
      %232 = vector.extract_strided_slice %42 {offsets = [4, 0], sizes = [1, 128], strides = [1, 1]} : vector<8x128xf32> to vector<1x128xf32>
      %233 = vector.shape_cast %232 : vector<1x128xf32> to vector<128xf32>
      %234 = vector.shape_cast %233 : vector<128xf32> to vector<1x128xf32>
      %235 = vector.broadcast %234 : vector<1x128xf32> to vector<2x128xf32>
      %236 = arith.subf %25, %235 : vector<2x128xf32>
      %237 = vector.broadcast %231 : vector<2x1xf32> to vector<2x128xf32>
      %238 = arith.mulf %237, %236 : vector<2x128xf32>
      %239 = arith.mulf %125, %182 : vector<2x1xf32>
      %240 = vector.broadcast %239 : vector<2x1xf32> to vector<2x128xf32>
      %241 = arith.mulf %238, %240 : vector<2x128xf32>
      %c0_52 = arith.constant 0 : index
      %c512 = arith.constant 512 : index
      %242 = vector.load %arg8[%c0_52, %c512] : memref<2x1024xf32, #tpu.memory_space<vmem>>, vector<2x128xf32>
      tpu.vector_store %arg8[%c0_52, %c512], %241 {strides = array<i32>} : memref<2x1024xf32, #tpu.memory_space<vmem>>, vector<2x128xf32>,
      %243 = vector.extract_strided_slice %41 {offsets = [0, 5], sizes = [2, 1], strides = [1, 1]} : vector<2x16xf32> to vector<2x1xf32>
      %244 = vector.extract_strided_slice %42 {offsets = [5, 0], sizes = [1, 128], strides = [1, 1]} : vector<8x128xf32> to vector<1x128xf32>
      %245 = vector.shape_cast %244 : vector<1x128xf32> to vector<128xf32>
      %246 = vector.shape_cast %245 : vector<128xf32> to vector<1x128xf32>
      %247 = vector.broadcast %246 : vector<1x128xf32> to vector<2x128xf32>
      %248 = arith.subf %25, %247 : vector<2x128xf32>
      %249 = vector.broadcast %243 : vector<2x1xf32> to vector<2x128xf32>
      %250 = arith.mulf %249, %248 : vector<2x128xf32>
      %251 = arith.mulf %142, %182 : vector<2x1xf32>
      %252 = vector.broadcast %251 : vector<2x1xf32> to vector<2x128xf32>
      %253 = arith.mulf %250, %252 : vector<2x128xf32>
      %c0_53 = arith.constant 0 : index
      %c640 = arith.constant 640 : index
      %254 = vector.load %arg8[%c0_53, %c640] : memref<2x1024xf32, #tpu.memory_space<vmem>>, vector<2x128xf32>
      tpu.vector_store %arg8[%c0_53, %c640], %253 {strides = array<i32>} : memref<2x1024xf32, #tpu.memory_space<vmem>>, vector<2x128xf32>,
      %255 = vector.extract_strided_slice %41 {offsets = [0, 6], sizes = [2, 1], strides = [1, 1]} : vector<2x16xf32> to vector<2x1xf32>
      %256 = vector.extract_strided_slice %42 {offsets = [6, 0], sizes = [1, 128], strides = [1, 1]} : vector<8x128xf32> to vector<1x128xf32>
      %257 = vector.shape_cast %256 : vector<1x128xf32> to vector<128xf32>
      %258 = vector.shape_cast %257 : vector<128xf32> to vector<1x128xf32>
      %259 = vector.broadcast %258 : vector<1x128xf32> to vector<2x128xf32>
      %260 = arith.subf %25, %259 : vector<2x128xf32>
      %261 = vector.broadcast %255 : vector<2x1xf32> to vector<2x128xf32>
      %262 = arith.mulf %261, %260 : vector<2x128xf32>
      %263 = arith.mulf %159, %182 : vector<2x1xf32>
      %264 = vector.broadcast %263 : vector<2x1xf32> to vector<2x128xf32>
      %265 = arith.mulf %262, %264 : vector<2x128xf32>
      %c0_54 = arith.constant 0 : index
      %c768 = arith.constant 768 : index
      %266 = vector.load %arg8[%c0_54, %c768] : memref<2x1024xf32, #tpu.memory_space<vmem>>, vector<2x128xf32>
      tpu.vector_store %arg8[%c0_54, %c768], %265 {strides = array<i32>} : memref<2x1024xf32, #tpu.memory_space<vmem>>, vector<2x128xf32>,
      %267 = vector.extract_strided_slice %41 {offsets = [0, 7], sizes = [2, 1], strides = [1, 1]} : vector<2x16xf32> to vector<2x1xf32>
      %268 = vector.extract_strided_slice %42 {offsets = [7, 0], sizes = [1, 128], strides = [1, 1]} : vector<8x128xf32> to vector<1x128xf32>
      %269 = vector.shape_cast %268 : vector<1x128xf32> to vector<128xf32>
      %270 = vector.shape_cast %269 : vector<128xf32> to vector<1x128xf32>
      %271 = vector.broadcast %270 : vector<1x128xf32> to vector<2x128xf32>
      %272 = arith.subf %25, %271 : vector<2x128xf32>
      %273 = vector.broadcast %267 : vector<2x1xf32> to vector<2x128xf32>
      %274 = arith.mulf %273, %272 : vector<2x128xf32>
      %275 = arith.mulf %176, %182 : vector<2x1xf32>
      %276 = vector.broadcast %275 : vector<2x1xf32> to vector<2x128xf32>
      %277 = arith.mulf %274, %276 : vector<2x128xf32>
      %c0_55 = arith.constant 0 : index
      %c896 = arith.constant 896 : index
      %278 = vector.load %arg8[%c0_55, %c896] : memref<2x1024xf32, #tpu.memory_space<vmem>>, vector<2x128xf32>
      tpu.vector_store %arg8[%c0_55, %c896], %277 {strides = array<i32>} : memref<2x1024xf32, #tpu.memory_space<vmem>>, vector<2x128xf32>,
    } else {
    }
    return
  }
  func.func @transform_0(%arg0: i32, %arg1: i32) -> (i32, i32, i32) {
    %c0_i32 = arith.constant 0 : i32
    %c0_i32_0 = arith.constant 0 : i32
    return %arg0, %arg1, %c0_i32 : i32, i32, i32
  }
  func.func @transform_1(%arg0: i32, %arg1: i32) -> (i32, i32) {
    %c0_i32 = arith.constant 0 : i32
    %c0_i32_0 = arith.constant 0 : i32
    return %arg1, %c0_i32 : i32, i32
  }
  func.func @transform_2(%arg0: i32, %arg1: i32) -> (i32, i32) {
    %c0_i32 = arith.constant 0 : i32
    %c0_i32_0 = arith.constant 0 : i32
    %c0_i32_1 = arith.constant 0 : i32
    return %c0_i32, %c0_i32_0 : i32, i32
  }
  func.func @transform_3(%arg0: i32, %arg1: i32) -> (i32, i32) {
    %c0_i32 = arith.constant 0 : i32
    %c0_i32_0 = arith.constant 0 : i32
    %c0_i32_1 = arith.constant 0 : i32
    return %c0_i32, %c0_i32_0 : i32, i32
  }
  func.func @transform_4(%arg0: i32, %arg1: i32) -> (i32, i32) {
    %c0_i32 = arith.constant 0 : i32
    %c0_i32_0 = arith.constant 0 : i32
    %c0_i32_1 = arith.constant 0 : i32
    return %c0_i32, %c0_i32_0 : i32, i32
  }
  func.func @transform_5(%arg0: i32, %arg1: i32) -> (i32, i32) {
    %c0_i32 = arith.constant 0 : i32
    %c0_i32_0 = arith.constant 0 : i32
    %c0_i32_1 = arith.constant 0 : i32
    return %c0_i32, %c0_i32_0 : i32, i32
  }
  func.func @transform_6(%arg0: i32, %arg1: i32) -> (i32, i32) {
    %c0_i32 = arith.constant 0 : i32
    %c0_i32_0 = arith.constant 0 : i32
    return %arg0, %c0_i32 : i32, i32
  }
  func.func @transform_7(%arg0: i32, %arg1: i32) -> (i32, i32) {
    %c0_i32 = arith.constant 0 : i32
    %c0_i32_0 = arith.constant 0 : i32
    return %arg0, %c0_i32 : i32, i32
  }
}

</mosaic_0001>

<bundles_post_ra>
// kernel: tpu_custom_call.1
= control target key start
LH: loop header
LB: loop body
LE: loop exit
PB: predicated region body
PF: predicated region fallthrough
CT: control target
= control target key end

     0   :  { %13 = vsyncpa [#allocation4], 0  ;;  %vm64_vm0 = vcmask 523264   ;;  %s1164_s0 = inlined_call_operand.vmem [shape: bf16[2,64,64], index: 0, kind: input, shape index: {}]   ;;  %s1165_s1 = inlined_call_operand.vmem [shape: f32[64,128], index: 1, kind: input, shape index: {}]   ;;  %s1166_s2 = inlined_call_operand.vmem [shape: f32[1,128], index: 2, kind: input, shape index: {}]   ;;  %s1167_s3 = inlined_call_operand.vmem [shape: f32[128,16], index: 3, kind: input, shape index: {}]   ;;  %s1168_s4 = inlined_call_operand.vmem [shape: f32[1,16], index: 4, kind: input, shape index: {}]   ;;  %s1169_s5 = inlined_call_operand.vmem [shape: f32[8,128], index: 5, kind: input, shape index: {}]   ;;  %s1170_s6 = inlined_call_operand.hbm [shape: f32[2,1024], index: 6, kind: output, shape index: {0}]   ;;  %s1171_s7 = inlined_call_operand.hbm [shape: f32[2,128], index: 7, kind: output, shape index: {1}]  }
   0x1   :  { %v680_v0 = vld [vmem:[%s1164_s0 + $0x20] sm:$0xff]   ;;  %v681_v6 = vld [vmem:[%s1164_s0 + $0x28] sm:$0xff]  }
   0x2   :  { %v646_v1 = vld [vmem:[%s1164_s0] sm:$0xff]   ;;  %v663_v2 = vunpack.c.l.bf16 %v680_v0  ;;  %v664_v4 = vunpack.c.h.bf16 %v680_v0  ;;  %v677_v7 = vld [vmem:[%s1164_s0 + $0x8] sm:$0xff]  }
   0x3   :  { %v647_v3 = vunpack.c.l.bf16 %v646_v1  ;;  %v648_v5 = vunpack.c.h.bf16 %v646_v1 }
   0x4   :  { %14 = vsyncpa [#allocation6], 0  ;;  %v89_v8 = vsel %vm64_vm0, %v663_v2, 0.0  ;;  %v92_v10 = vsel %vm64_vm0, %v664_v4, 0.0  ;;  %v667_v12 = vunpack.c.l.bf16 %v681_v6  ;;  %v651_v13 = vunpack.c.l.bf16 %v677_v7  ;;  %v682_v18 = vld [vmem:[%s1164_s0 + $0x30] sm:$0xff]   ;;  %v683_v28 = vld [vmem:[%s1164_s0 + $0x38] sm:$0xff]  }
   0x5   :  { %v65_v9 = vsel %vm64_vm0, %v647_v3, 0.0  ;;  %90 = vadd.xlane.f32.xlu1 %v89_v8  ;;  %v68_v11 = vsel %vm64_vm0, %v648_v5, 0.0  ;;  %v668_v16 = vunpack.c.h.bf16 %v681_v6  ;;  %v652_v17 = vunpack.c.h.bf16 %v677_v7  ;;  %v678_v19 = vld [vmem:[%s1164_s0 + $0x10] sm:$0xff]   ;;  %v679_v29 = vld [vmem:[%s1164_s0 + $0x18] sm:$0xff]   ;;  %v119_v43 = vld [vmem:[%s1165_s1 + $0x28] sm:$0xff] }
   0x6   :  { %66 = vadd.xlane.f32.xlu0 %v65_v9  ;;  %v95_v14 = vsel %vm64_vm0, %v667_v12, 0.0  ;;  %v71_v15 = vsel %vm64_vm0, %v651_v13, 0.0  ;;  %v671_v22 = vunpack.c.l.bf16 %v682_v18  ;;  %v655_v23 = vunpack.c.l.bf16 %v678_v19  ;;  %v121_v41 = vld [vmem:[%s1165_s1 + $0x38] sm:$0xff]  ;;  %v120_v42 = vld [vmem:[%s1165_s1 + $0x30] sm:$0xff]  ;;  %v118_v44 = vld [vmem:[%s1165_s1 + $0x20] sm:$0xff] }
   0x7   :  { %v98_v20 = vsel %vm64_vm0, %v668_v16, 0.0  ;;  %v74_v21 = vsel %vm64_vm0, %v652_v17, 0.0  ;;  %v672_v26 = vunpack.c.h.bf16 %v682_v18  ;;  %v656_v27 = vunpack.c.h.bf16 %v678_v19  ;;  %v117_v45 = vld [vmem:[%s1165_s1 + $0x18] sm:$0xff]  ;;  %v116_v46 = vld [vmem:[%s1165_s1 + $0x10] sm:$0xff]  ;;  %v115_v47 = vld [vmem:[%s1165_s1 + $0x8] sm:$0xff] }
   0x8   :  { %v101_v24 = vsel %vm64_vm0, %v671_v22, 0.0  ;;  %v77_v25 = vsel %vm64_vm0, %v655_v23, 0.0  ;;  %v675_v32 = vunpack.c.l.bf16 %v683_v28  ;;  %v659_v33 = vunpack.c.l.bf16 %v679_v29  ;;  %v114_v48 = vld [vmem:[%s1165_s1] sm:$0xff] }
   0x9   :  { %93 = vadd.xlane.f32.xlu1 %v92_v10  ;;  %v104_v30 = vsel %vm64_vm0, %v672_v26, 0.0  ;;  %v80_v31 = vsel %vm64_vm0, %v656_v27, 0.0  ;;  %v676_v36 = vunpack.c.h.bf16 %v683_v28  ;;  %v660_v37 = vunpack.c.h.bf16 %v679_v29 }
   0xa   :  { %69 = vadd.xlane.f32.xlu0 %v68_v11  ;;  %v107_v34 = vsel %vm64_vm0, %v675_v32, 0.0  ;;  %v83_v35 = vsel %vm64_vm0, %v659_v33, 0.0  ;;  %v852_v40 = vmov 0.0   ;;  %vm853_vm1 = vmmov 0  }
   0xb   :  { %v110_v38 = vsel %vm64_vm0, %v676_v36, 0.0  ;;  %v86_v39 = vsel %vm64_vm0, %v660_v37, 0.0  ;;  %710 = vmatprep.subr.mxu0 %v852_v40  ;;  %31 = vst [vmem:[#allocation2] sm:$0x3] %v852_v40  ;;  %729 = vmatprep.subr.mxu1 %v852_v40  ;;  %v138_v53 = vlaneseq  ;;  %vm149_vm2 = vcmask 130112  }
   0xc   :  { %711 = vmatpush3.msra.mxu0 %v121_v41  ;;  %726 = vmatprep.mubr.msk.f32.mxu0 %vm853_vm1, %v852_v40  ;;  %vm156_vm3 = vcmask 195712   ;;  %vm163_vm4 = vcmask 261312   ;;  %vm170_vm5 = vcmask 326912   ;;  %vm177_vm6 = vcmask 392512  }
   0xd   :  { %96 = vadd.xlane.f32.xlu1 %v95_v14  ;;  %712 = vmatprep.subr.mxu0 %v852_v40  ;;  %v139_v56 = vand.u32 127, %v138_v53  ;;  %v980_v61 = vshrl.u32 %v138_v53, 7  ;;  %vm184_vm7 = vcmask 458112   ;;  %vm191_vm8 = vcmask 523712   ;;  %v342_v53 = vld [vmem:[%s1167_s3 + $0x68] sm:$0xff] }
   0xe   :  { %72 = vadd.xlane.f32.xlu0 %v71_v15  ;;  %713 = vmatpush3.msra.mxu0 %v120_v42  ;;  %vm232_vm9 = vcmask 1041409   ;;  %vm321_vm10 = vcmask 1041408   ;;  %vm422_vm11 = vcmask 123904  }
   0xf   :  { %714 = vmatprep.subr.mxu0 %v852_v40  ;;  %761 = vmatprep.mubr.msk.f32.mxu1 %vm853_vm1, %v852_v40  ;;  %v144_v59 = vadd.s32 4294967288, %v139_v56  ;;  %v151_v60 = vadd.s32 4294967280, %v139_v56  ;;  %v158_v62 = vadd.s32 4294967272, %v139_v56  ;;  %v165_v63 = vadd.s32 4294967264, %v139_v56 }
  0x10   :  { %715 = vmatpush3.msra.mxu0 %v119_v43  ;;  %v172_v3 = vadd.s32 4294967256, %v139_v56  ;;  %v179_v5 = vadd.s32 4294967248, %v139_v56  ;;  %v142_v6 = vsub.s32 %v139_v56, %v980_v61  ;;  %v186_v11 = vadd.s32 4294967240, %v139_v56  ;;  %v339_v56 = vld [vmem:[%s1167_s3 + $0x50] sm:$0xff] }
  0x11   :  { %99 = vadd.xlane.f32.xlu1 %v98_v20  ;;  %716 = vmatprep.subr.mxu0 %v852_v40  ;;  %v147_v2 = vsub.s32 %v144_v59, %v980_v61  ;;  %v154_v4 = vsub.s32 %v151_v60, %v980_v61  ;;  %v161_v7 = vsub.s32 %v158_v62, %v980_v61 }
  0x12   :  { %75 = vadd.xlane.f32.xlu0 %v74_v21  ;;  %717 = vmatpush3.msra.mxu0 %v118_v44  ;;  %v168_v8 = vsub.s32 %v165_v63, %v980_v61  ;;  %v175_v14 = vsub.s32 %v172_v3, %v980_v61  ;;  %v182_v17 = vsub.s32 %v179_v5, %v980_v61  ;;  %v643_v63 = vld [vmem:[%s1166_s2] ss:$0 sm:$0xff]  ;;  %v336_v5 = vld [vmem:[%s1167_s3 + $0x38] sm:$0xff] }
  0x13   :  { %718 = vmatprep.subr.mxu0 %v852_v40  ;;  %v189_v26 = vsub.s32 %v186_v11, %v980_v61  ;;  %v330_v11 = vld [vmem:[%s1167_s3 + $0x8] sm:$0xff] }
  0x14   :  { %719 = vmatpush3.msra.mxu0 %v117_v45 }
  0x15   :  { %102 = vadd.xlane.f32.xlu1 %v101_v24  ;;  %720 = vmatprep.subr.mxu0 %v852_v40 }
  0x16   :  { %78 = vadd.xlane.f32.xlu0 %v77_v25  ;;  %721 = vmatpush3.msra.mxu0 %v116_v46 }
  0x17   :  { %722 = vmatprep.subr.mxu0 %v852_v40 }
  0x18   :  { %723 = vmatpush3.msra.mxu0 %v115_v47 }
  0x19   :  { %105 = vadd.xlane.f32.xlu1 %v104_v30  ;;  %724 = vmatprep.subr.mxu0 %v852_v40 }
  0x1a   :  { %81 = vadd.xlane.f32.xlu0 %v80_v31  ;;  %725 = vmatpush3.msra.mxu0 %v114_v48 }
  0x1d   :  { %108 = vadd.xlane.f32.xlu1 %v107_v34 }
  0x1e   :  { %84 = vadd.xlane.f32.xlu0 %v83_v35 }
  0x21   :  { %111 = vadd.xlane.f32.xlu1 %v110_v38 }
  0x22   :  { %87 = vadd.xlane.f32.xlu0 %v86_v39 }
  0x8e   :  { %v91_v49 = vpop.xlane.xlu1 %90 }
  0x8f   :  { %v67_v50 = vpop.xlane.xlu0 %66  ;;  %v196_v18 = vrot.slane %v91_v49, %v142_v6 }
  0x90   :  { %v143_v19 = vrot.slane %v67_v50, %v142_v6  ;;  %v335_v6 = vld [vmem:[%s1167_s3 + $0x30] sm:$0xff] }
  0x92   :  { %v94_v51 = vpop.xlane.xlu1 %93 }
  0x93   :  { %v70_v52 = vpop.xlane.xlu0 %69  ;;  %v200_v12 = vrot.slane %v94_v51, %v147_v2  ;;  %v344_v51 = vld [vmem:[%s1167_s3 + $0x78] sm:$0xff] }
  0x94   :  { %v148_v13 = vrot.slane %v70_v52, %v147_v2  ;;  %v343_v52 = vld [vmem:[%s1167_s3 + $0x70] sm:$0xff]  ;;  %730 = vmatpush3.msra.mxu1 %v344_v51 }
  0x95   :  { %v201_v27 = vsel %vm149_vm2, %v200_v12, %v196_v18  ;;  %731 = vmatprep.subr.mxu1 %v852_v40  ;;  %v329_v12 = vld [vmem:[%s1167_s3] sm:$0xff] }
  0x96   :  { %v97_v54 = vpop.xlane.xlu1 %96  ;;  %v150_v28 = vsel %vm149_vm2, %v148_v13, %v143_v19  ;;  %732 = vmatpush3.msra.mxu1 %v343_v52 }
  0x97   :  { %v73_v55 = vpop.xlane.xlu0 %72  ;;  %v205_v15 = vrot.slane %v97_v54, %v154_v4  ;;  %733 = vmatprep.subr.mxu1 %v852_v40  ;;  %v341_v54 = vld [vmem:[%s1167_s3 + $0x60] sm:$0xff] }
  0x98   :  { %v155_v16 = vrot.slane %v73_v55, %v154_v4  ;;  %734 = vmatpush3.msra.mxu1 %v342_v53  ;;  %v340_v55 = vld [vmem:[%s1167_s3 + $0x58] sm:$0xff]  ;;  %v337_v4 = vld [vmem:[%s1167_s3 + $0x40] sm:$0xff] }
  0x99   :  { %v206_v31 = vsel %vm156_vm3, %v205_v15, %v201_v27  ;;  %735 = vmatprep.subr.mxu1 %v852_v40  ;;  %v571_v15 = vsub.s32 7, %v980_v61 }
  0x9a   :  { %v100_v57 = vpop.xlane.xlu1 %99  ;;  %v157_v32 = vsel %vm156_vm3, %v155_v16, %v150_v28  ;;  %736 = vmatpush3.msra.mxu1 %v341_v54  ;;  %v1072_v16 = vld [vmem:[%s1169_s5] sm:$0xff] }
  0x9b   :  { %v76_v58 = vpop.xlane.xlu0 %75  ;;  %v210_v20 = vrot.slane %v100_v57, %v161_v7  ;;  %737 = vmatprep.subr.mxu1 %v852_v40  ;;  %v338_v57 = vld [vmem:[%s1167_s3 + $0x48] sm:$0xff]  ;;  %v1075_v18 = vrot.slane %v1072_v16, %v571_v15  ;;  %v514_v15 = vsub.s32 4, %v980_v61 }
  0x9c   :  { %v162_v21 = vrot.slane %v76_v58, %v161_v7  ;;  %738 = vmatpush3.msra.mxu1 %v340_v55  ;;  %v113_v58 = vld [vmem:[#allocation2] sm:$0x3]  ;;  %v334_v7 = vld [vmem:[%s1167_s3 + $0x28] sm:$0xff] }
  0x9d   :  { %v211_v35 = vsel %vm163_vm4, %v210_v20, %v206_v31  ;;  %739 = vmatprep.subr.mxu1 %v852_v40  ;;  %v644_v20 = vld [vmem:[%s1168_s4] ss:$0 sm:$0xff]  ;;  %v855_v31 = vmov 0   ;;  %s862_s4 = smov [#allocation5]  }
  0x9e   :  { %v103_v0 = vpop.xlane.xlu1 %102  ;;  %v164_v36 = vsel %vm163_vm4, %v162_v21, %v157_v32  ;;  %740 = vmatpush3.msra.mxu1 %v339_v56  ;;  %776 = vset.pattern.permute.xlu1 %v855_v31  ;;  %s630_s5 = sshll.u32 %s862_s4, 4  ;;  %s631_s5 = int_to_ptr.vmem [resolvable:$true] %s630_s5 }
  0x9f   :  { %v79_v1 = vpop.xlane.xlu0 %78  ;;  %v215_v22 = vrot.slane %v103_v0, %v168_v8  ;;  %741 = vmatprep.subr.mxu1 %v852_v40  ;;  %s808_s18 = scalar_lea.vmem %s631_s5, 32  ;;  %p813_p1 = scmp.lt.s32.totalorder %s631_s5, %s631_s5 }
  0xa0   :  { %v169_v23 = vrot.slane %v79_v1, %v168_v8  ;;  %742 = vmatpush3.msra.mxu1 %v338_v57  ;;  %v333_v8 = vld [vmem:[%s1167_s3 + $0x20] sm:$0xff]  ;;  %p809_p0 = scmp.ne.s32.totalorder %s631_s5, %s808_s18  ;;  %p814_p2 = scmp.lt.s32.totalorder %s808_s18, %s808_s18 }
  0xa1   :  { %v216_v37 = vsel %vm170_vm5, %v215_v22, %v211_v35  ;;  %743 = vmatprep.subr.mxu1 %v852_v40  ;;  %v856_v35 = vmov 2  }
  0xa2   :  { %v106_v9 = vpop.xlane.xlu1 %105  ;;  %v171_v38 = vsel %vm170_vm5, %v169_v23, %v164_v36  ;;  %744 = vmatpush3.msra.mxu1 %v337_v4  ;;  %v857_v36 = vmov 3   ;;  %p815_p3 = por %p814_p2, %p813_p1 }
  0xa3   :  { %v82_v10 = vpop.xlane.xlu0 %81  ;;  %v220_v29 = vrot.slane %v106_v9, %v175_v14  ;;  %745 = vmatprep.subr.mxu1 %v852_v40  ;;  %v332_v9 = vld [vmem:[%s1167_s3 + $0x18] sm:$0xff] }
  0xa4   :  { %v176_v30 = vrot.slane %v82_v10, %v175_v14  ;;  %746 = vmatpush3.msra.mxu1 %v336_v5  ;;  %v331_v10 = vld [vmem:[%s1167_s3 + $0x10] sm:$0xff]  ;;  %p816_p4 = pnand %p815_p3, %p809_p0 }
  0xa5   :  { %v221_v42 = vsel %vm177_vm6, %v220_v29, %v216_v37  ;;  %747 = vmatprep.subr.mxu1 %v852_v40  ;;  %v858_v37 = vmov 4  }
  0xa6   :  { %v109_v24 = vpop.xlane.xlu1 %108  ;;  %v178_v43 = vsel %vm177_vm6, %v176_v30, %v171_v38  ;;  %748 = vmatpush3.msra.mxu1 %v335_v6  ;;  %v854_v30 = vmov 1   ;;  %v859_v38 = vmov 6  }
  0xa7   :  { %v85_v25 = vpop.xlane.xlu0 %84  ;;  %v225_v33 = vrot.slane %v109_v24, %v182_v17  ;;  %749 = vmatprep.subr.mxu1 %v852_v40  ;;  %777 = vset.pattern.permute.xlu0 %v854_v30 }
  0xa8   :  { %v183_v34 = vrot.slane %v85_v25, %v182_v17  ;;  %750 = vmatpush3.msra.mxu1 %v334_v7 }
  0xa9   :  { %v226_v46 = vsel %vm184_vm7, %v225_v33, %v221_v42  ;;  %751 = vmatprep.subr.mxu1 %v852_v40  ;;  %v457_v42 = vsub.s32 1, %v980_v61 }
  0xaa   :  { %v112_v39 = vpop.xlane.xlu1 %111  ;;  %v185_v47 = vsel %vm184_vm7, %v183_v34, %v178_v43  ;;  %752 = vmatpush3.msra.mxu1 %v333_v8  ;;  %v437_v43 = vsub.s32 0, %v980_v61 }
  0xab   :  { %v88_v41 = vpop.xlane.xlu0 %87  ;;  %v230_v44 = vrot.slane %v112_v39, %v189_v26  ;;  %753 = vmatprep.subr.mxu1 %v852_v40  ;;  %v860_v39 = vmov 5  }
  0xac   :  { %v190_v45 = vrot.slane %v88_v41, %v189_v26  ;;  %754 = vmatpush3.msra.mxu1 %v332_v9  ;;  %v861_v41 = vmov 7  }
  0xad   :  { %v231_v48 = vsel %vm191_vm8, %v230_v44, %v226_v46  ;;  %755 = vmatprep.subr.mxu1 %v852_v40  ;;  %v458_v44 = vrot.slane %v1072_v16, %v457_v42  ;;  %v476_v46 = vsub.s32 2, %v980_v61 }
  0xae   :  { %v192_v49 = vsel %vm191_vm8, %v190_v45, %v185_v47  ;;  %756 = vmatpush3.msra.mxu1 %v331_v10  ;;  %v438_v45 = vrot.slane %v1072_v16, %v437_v43  ;;  %v495_v47 = vsub.s32 3, %v980_v61 }
  0xaf   :  { %v233_v50 = vsel %vm232_vm9, %v231_v48, %v192_v49  ;;  %757 = vmatprep.subr.mxu1 %v852_v40  ;;  %v477_v52 = vrot.slane %v1072_v16, %v476_v46 }
  0xb0   :  { %727 = vmatmul.mubr.msk.f32.vlgmr.msra.gmra.mxu0 %vm64_vm0, %v233_v50  ;;  %758 = vmatpush3.msra.mxu1 %v330_v11  ;;  %v496_v53 = vrot.slane %v1072_v16, %v495_v47 }
  0xb1   :  { %759 = vmatprep.subr.mxu1 %v852_v40 }
  0xb2   :  { %760 = vmatpush3.msra.mxu1 %v329_v12 }
 0x170   :  { %v302_v59 = vpop.f32.mrf.mxu0 }
 0x171   :  { %v306_v60 = vadd.f32 %v302_v59, %v113_v58 }
 0x172   :  { %v728_v62 = vpop.f32.mrf.mxu0 }
 0x173   :  { %307 = vst [vmem:[#allocation2] sm:$0x3] %v306_v60 }
 0x17a   :  { %v311_v0 = vld [vmem:[#allocation2] sm:$0x3] }
 0x17b   :  { %v319_v1 = vadd.f32 %v643_v63, %v311_v0 }
 0x17d   :  { %v320_v2 = vmul.f32 %v319_v1, %v319_v1 }
 0x17f   :  { %v322_v3 = vsel %vm321_vm10, %v320_v2, 0.0 }
 0x180   :  { %323 = vadd.xlane.f32.xlu0 %v322_v3  ;;  %v533_v3 = vsub.s32 5, %v980_v61 }
 0x182   :  { %v534_v7 = vrot.slane %v1072_v16, %v533_v3 }
 0x209   :  { %v324_v13 = vpop.xlane.xlu0 %323 }
 0x20a   :  { %v325_v14 = vmax.f32 %v324_v13, 1e-24 }
 0x20c   :  { %784 = vrsqrt.f32 %v325_v14 }
 0x219   :  { %v785_v17 = vpop.eup %784 }
 0x21a   :  { %v1077_v40 = vmul.f32 %v785_v17, %v319_v1  ;;  %v515_v17 = vrot.slane %v1072_v16, %v514_v15 }
 0x21c   :  { %328 = vst [vmem:[#allocation5] sm:$0x3] %v1077_v40  ;;  %762 = vmatmul.mubr.f32.vlgmr.msra.gmra.mxu1 %v1077_v40  ;;  %v573_v19 = vsub.f32 %v1077_v40, %v1075_v18  ;;  %v459_v48 = vsub.f32 %v1077_v40, %v458_v44  ;;  %v439_v49 = vsub.f32 %v1077_v40, %v438_v45 }
 0x21d   :  { %v478_v58 = vsub.f32 %v1077_v40, %v477_v52  ;;  %v497_v59 = vsub.f32 %v1077_v40, %v496_v53  ;;  %v535_v9 = vsub.f32 %v1077_v40, %v534_v7 }
 0x2dc   :  { %v418_v21 = vpop.f32.mrf.mxu1 }
 0x2dd   :  { %v419_v22 = vadd.f32 %v644_v20, %v418_v21  ;;  %v552_v20 = vsub.s32 6, %v980_v61  ;;  %v516_v21 = vsub.f32 %v1077_v40, %v515_v17 }
 0x2de   :  { %v763_v23 = vpop.f32.mrf.mxu1 }
 0x2df   :  { %v423_v24 = vsel %vm422_vm11, %v419_v22, -inf }
 0x2e0   :  { %424 = vmax.xlane.f32.xlu1 %v423_v24 }
 0x369   :  { %v425_v25 = vpop.xlane.xlu1 %424 }
 0x36a   :  { %v426_v26 = vsub.f32 %v419_v22, %v425_v25  ;;  %v553_v22 = vrot.slane %v1072_v16, %v552_v20 }
 0x36c   :  { %v427_v27 = vmul.f32 1.442695, %v426_v26  ;;  %v554_v25 = vsub.f32 %v1077_v40, %v553_v22 }
 0x36e   :  { %786 = vpow2.f32 %v427_v27 }
 0x37b   :  { %v787_v28 = vpop.eup %786 }
 0x37c   :  { %v429_v29 = vsel %vm422_vm11, %v787_v28, 0.0 }
 0x37d   :  { %430 = vadd.xlane.f32.xlu0 %v429_v29 }
 0x406   :  { %v431_v32 = vpop.xlane.xlu0 %430 }
 0x407   :  { %788 = vrcp.f32 %v431_v32 }
 0x414   :  { %v789_v33 = vpop.eup %788 }
 0x415   :  { %v433_v34 = vmul.f32 %v789_v33, %v787_v28 }
 0x417   :  { %461 = vperm.xlu0 %777, %v433_v34   ;;  %442 = vperm.xlu1 %776, %v433_v34  }
 0x41b   :  { %778 = vset.pattern.permute.xlu0 %v856_v35  ;;  %779 = vset.pattern.permute.xlu1 %v857_v36 }
 0x41c   :  { %480 = vperm.xlu0 %778, %v433_v34   ;;  %499 = vperm.xlu1 %779, %v433_v34  }
 0x420   :  { %780 = vset.pattern.permute.xlu0 %v858_v37  ;;  %782 = vset.pattern.permute.xlu1 %v859_v38 }
 0x421   :  { %518 = vperm.xlu0 %780, %v433_v34   ;;  %556 = vperm.xlu1 %782, %v433_v34  }
 0x425   :  { %781 = vset.pattern.permute.xlu0 %v860_v39 }
 0x426   :  { %537 = vperm.xlu0 %781, %v433_v34  }
 0x42a   :  { %783 = vset.pattern.permute.xlu0 %v861_v41 }
 0x492   :  { %v462_v50 = vpop.permute.xlu0 %461  ;;  %v443_v51 = vpop.permute.xlu1 %442 }
 0x493   :  { %v1096_v54 = vmul.f32 %v462_v50, %v459_v48  ;;  %v1098_v55 = vmul.f32 %v443_v51, %v439_v49 }
 0x495   :  { %v465_v56 = vmul.f32 %v1096_v54, %v1096_v54  ;;  %v446_v57 = vmul.f32 %v1098_v55, %v1098_v55 }
 0x497   :  { %v481_v60 = vpop.permute.xlu0 %480  ;;  %v500_v62 = vpop.permute.xlu1 %499  ;;  %v466_v63 = vsel %vm321_vm10, %v465_v56, 0.0  ;;  %v447_v0 = vsel %vm321_vm10, %v446_v57, 0.0 }
 0x498   :  { %v1108_v1 = vmul.f32 %v481_v60, %v478_v58  ;;  %v1110_v2 = vmul.f32 %v500_v62, %v497_v59  ;;  %467 = vadd.xlane.f32.xlu1 %v466_v63  ;;  %448 = vadd.xlane.f32.xlu0 %v447_v0 }
 0x49a   :  { %v484_v4 = vmul.f32 %v1108_v1, %v1108_v1  ;;  %v503_v8 = vmul.f32 %v1110_v2, %v1110_v2 }
 0x49c   :  { %v519_v5 = vpop.permute.xlu0 %518  ;;  %v485_v6 = vsel %vm321_vm10, %v484_v4, 0.0  ;;  %v504_v10 = vsel %vm321_vm10, %v503_v8, 0.0  ;;  %v557_v24 = vpop.permute.xlu1 %556 }
 0x49d   :  { %486 = vadd.xlane.f32.xlu1 %v485_v6  ;;  %v1131_v23 = vmul.f32 %v519_v5, %v516_v21  ;;  %v1134_v26 = vmul.f32 %v557_v24, %v554_v25 }
 0x49f   :  { %v522_v27 = vmul.f32 %v1131_v23, %v1131_v23  ;;  %v560_v29 = vmul.f32 %v1134_v26, %v1134_v26 }
 0x4a1   :  { %v538_v11 = vpop.permute.xlu0 %537  ;;  %505 = vadd.xlane.f32.xlu1 %v504_v10  ;;  %v523_v28 = vsel %vm321_vm10, %v522_v27, 0.0  ;;  %v561_v61 = vsel %vm321_vm10, %v560_v29, 0.0 }
 0x4a2   :  { %v1121_v12 = vmul.f32 %v538_v11, %v535_v9 }
 0x4a4   :  { %v541_v13 = vmul.f32 %v1121_v12, %v1121_v12 }
 0x4a6   :  { %v542_v14 = vsel %vm321_vm10, %v541_v13, 0.0 }
 0x4a7   :  { %543 = vadd.xlane.f32.xlu1 %v542_v14 }
 0x4ae   :  { %575 = vperm.xlu0 %783, %v433_v34  }
 0x4cd   :  { %524 = vadd.xlane.f32.xlu0 %v523_v28 }
 0x4d1   :  { %562 = vadd.xlane.f32.xlu0 %v561_v61 }
 0x521   :  { %v449_v16 = vpop.xlane.xlu0 %448 }
 0x529   :  { %v576_v30 = vpop.permute.xlu0 %575 }
 0x52a   :  { %v1145_v31 = vmul.f32 %v576_v30, %v573_v19 }
 0x52c   :  { %v579_v32 = vmul.f32 %v1145_v31, %v1145_v31 }
 0x52e   :  { %v580_v33 = vsel %vm321_vm10, %v579_v32, 0.0 }
 0x52f   :  { %581 = vadd.xlane.f32.xlu1 %v580_v33 }
 0x530   :  { %819 = shalt.err (!%p816_p4)
}
 0x531   :  { %633 = dma.vmem_to_hbm [thread:$0]  %s631_s5, 32, %s1171_s7, [#allocation6]   ;;  %v468_v18 = vpop.xlane.xlu1 %467  ;;  %v450_v19 = vmax.f32 %v449_v16, 1e-24 }
 0x532   :  { %v469_v34 = vmax.f32 %v468_v18, 1e-24  ;;  %s863_s7 = smov [#allocation3]  }
 0x533   :  { %790 = vrsqrt.f32 %v450_v19  ;;  %s620_s21 = sshll.u32 %s863_s7, 4  ;;  %s621_s21 = int_to_ptr.vmem [resolvable:$true] %s620_s21 }
 0x534   :  { %792 = vrsqrt.f32 %v469_v34  ;;  %s828_s22 = scalar_lea.vmem %s621_s21, 256  ;;  %p833_p6 = scmp.lt.s32.totalorder %s621_s21, %s621_s21 }
 0x535   :  { %v487_v40 = vpop.xlane.xlu1 %486  ;;  %p829_p5 = scmp.ne.s32.totalorder %s621_s21, %s828_s22  ;;  %p834_p7 = scmp.lt.s32.totalorder %s828_s22, %s828_s22 }
 0x536   :  { %v488_v36 = vmax.f32 %v487_v40, 1e-24 }
 0x537   :  { %p835_p8 = por %p834_p7, %p833_p6 }
 0x538   :  { %794 = vrsqrt.f32 %v488_v36 }
 0x539   :  { %v506_v35 = vpop.xlane.xlu1 %505  ;;  %p836_p9 = pnand %p835_p8, %p829_p5 }
 0x53a   :  { %v507_v38 = vmax.f32 %v506_v35, 1e-24 }
 0x53c   :  { %796 = vrsqrt.f32 %v507_v38 }
 0x53d   :  { %v544_v41 = vpop.xlane.xlu1 %543 }
 0x53e   :  { %v545_v43 = vmax.f32 %v544_v41, 1e-24 }
 0x540   :  { %v791_v45 = vpop.eup %790 }
 0x541   :  { %v793_v46 = vpop.eup %792  ;;  %v452_v48 = vmul.f32 %v791_v45, %v791_v45 }
 0x542   :  { %v471_v49 = vmul.f32 %v793_v46, %v793_v46 }
 0x543   :  { %v453_v56 = vmul.f32 %v452_v48, %v449_v16 }
 0x544   :  { %v472_v57 = vmul.f32 %v471_v49, %v468_v18 }
 0x545   :  { %v795_v47 = vpop.eup %794 }
 0x546   :  { %v490_v51 = vmul.f32 %v795_v47, %v795_v47  ;;  %v473_v63 = vadd.f32 %v472_v57, %v453_v56 }
 0x548   :  { %v491_v60 = vmul.f32 %v490_v51, %v487_v40 }
 0x549   :  { %v797_v50 = vpop.eup %796 }
 0x54a   :  { %v509_v58 = vmul.f32 %v797_v50, %v797_v50  ;;  %v492_v4 = vadd.f32 %v491_v60, %v473_v63 }
 0x54c   :  { %v510_v0 = vmul.f32 %v509_v58, %v506_v35 }
 0x54e   :  { %v511_v7 = vadd.f32 %v510_v0, %v492_v4 }
 0x556   :  { %v525_v37 = vpop.xlane.xlu0 %524 }
 0x557   :  { %v526_v39 = vmax.f32 %v525_v37, 1e-24 }
 0x559   :  { %798 = vrsqrt.f32 %v526_v39 }
 0x55a   :  { %v563_v42 = vpop.xlane.xlu0 %562  ;;  %800 = vrsqrt.f32 %v545_v43 }
 0x55b   :  { %v564_v44 = vmax.f32 %v563_v42, 1e-24 }
 0x55d   :  { %802 = vrsqrt.f32 %v564_v44 }
 0x566   :  { %v799_v52 = vpop.eup %798 }
 0x567   :  { %v528_v62 = vmul.f32 %v799_v52, %v799_v52  ;;  %v801_v3 = vpop.eup %800 }
 0x568   :  { %v547_v8 = vmul.f32 %v801_v3, %v801_v3 }
 0x569   :  { %v529_v5 = vmul.f32 %v528_v62, %v525_v37 }
 0x56a   :  { %v803_v6 = vpop.eup %802  ;;  %v548_v11 = vmul.f32 %v547_v8, %v544_v41 }
 0x56b   :  { %v530_v9 = vadd.f32 %v529_v5, %v511_v7  ;;  %v566_v10 = vmul.f32 %v803_v6, %v803_v6 }
 0x56d   :  { %v549_v13 = vadd.f32 %v548_v11, %v530_v9  ;;  %v567_v14 = vmul.f32 %v566_v10, %v563_v42 }
 0x56f   :  { %v568_v20 = vadd.f32 %v567_v14, %v549_v13 }
 0x5b8   :  { %v582_v53 = vpop.xlane.xlu1 %581 }
 0x5b9   :  { %v583_v59 = vmax.f32 %v582_v53, 1e-24 }
 0x5bb   :  { %804 = vrsqrt.f32 %v583_v59 }
 0x5c8   :  { %v805_v15 = vpop.eup %804 }
 0x5c9   :  { %v585_v17 = vmul.f32 %v805_v15, %v805_v15 }
 0x5cb   :  { %v586_v21 = vmul.f32 %v585_v17, %v582_v53 }
 0x5cd   :  { %v587_v22 = vadd.f32 %v586_v21, %v568_v20 }
 0x5cf   :  { %v588_v24 = vmax.f32 %v587_v22, 1e-24 }
 0x5d1   :  { %806 = vrsqrt.f32 %v588_v24 }
 0x5de   :  { %v807_v25 = vpop.eup %806 }
 0x5df   :  { %v611_v27 = vmul.f32 %v807_v25, %v805_v15  ;;  %v590_v28 = vmul.f32 %v807_v25, %v791_v45  ;;  %v593_v29 = vmul.f32 %v807_v25, %v793_v46  ;;  %v596_v61 = vmul.f32 %v807_v25, %v795_v47 }
 0x5e0   :  { %v599_v16 = vmul.f32 %v807_v25, %v797_v50  ;;  %v602_v30 = vmul.f32 %v807_v25, %v799_v52  ;;  %v605_v32 = vmul.f32 %v807_v25, %v801_v3  ;;  %v608_v33 = vmul.f32 %v807_v25, %v803_v6 }
 0x5e1   :  { %v612_v18 = vmul.f32 %v611_v27, %v1145_v31  ;;  %v591_v40 = vmul.f32 %v590_v28, %v1098_v55  ;;  %v594_v19 = vmul.f32 %v593_v29, %v1096_v54  ;;  %v597_v34 = vmul.f32 %v596_v61, %v1108_v1 }
 0x5e2   :  { %v600_v35 = vmul.f32 %v599_v16, %v1110_v2  ;;  %v603_v36 = vmul.f32 %v602_v30, %v1131_v23  ;;  %v606_v37 = vmul.f32 %v605_v32, %v1121_v12  ;;  %v609_v38 = vmul.f32 %v608_v33, %v1134_v26 }
 0x5e3   :  { %613 = vst [vmem:[#allocation3 + $0xe] sm:$0x3] %v612_v18  ;;  %592 = vst [vmem:[#allocation3] sm:$0x3] %v591_v40 }
 0x5e4   :  { %595 = vst [vmem:[#allocation3 + $0x2] sm:$0x3] %v594_v19  ;;  %598 = vst [vmem:[#allocation3 + $0x4] sm:$0x3] %v597_v34 }
 0x5e5   :  { %601 = vst [vmem:[#allocation3 + $0x6] sm:$0x3] %v600_v35  ;;  %604 = vst [vmem:[#allocation3 + $0x8] sm:$0x3] %v603_v36 }
 0x5e6   :  { %607 = vst [vmem:[#allocation3 + $0xa] sm:$0x3] %v606_v37  ;;  %610 = vst [vmem:[#allocation3 + $0xc] sm:$0x3] %v609_v38 }
 0x5e7   :  { %839 = shalt.err (!%p836_p9)
}
 0x5e8   :  { %623 = dma.vmem_to_hbm [thread:$0]  %s621_s21, 256, %s1170_s6, [#allocation4]  }
 0x5e9   :  { %848 = dma.done.wait [#allocation4], 256  }
 0x5ea   :  { %849 = vsyncadd [#allocation4], 4294967040 }
 0x5eb   :  { %850 = dma.done.wait [#allocation6], 32  }
 0x5ec   :  { %851 = vsyncadd [#allocation6], 4294967264 }
 0x5ed   :  { %640 = vsyncpa [#allocation4], 1 }
 0x5ee   :  { %641 = vsyncpa [#allocation6], 1 }

</bundles_post_ra>
